<compile_context>
chip_gen: v7x
topology: tpu7x:2x2x1
jax: 0.10.0
libtpu: 0.0.40
codegen_flags: <defaults>
</compile_context>

<pallas_src>
import jax
import jax.numpy as jnp
from jax.experimental import pallas as pl
from jax.experimental.pallas import tpu as pltpu


def _round_up(a, b):
    return (a + b - 1) // b * b


def _cdiv(a, b):
    return (a + b - 1) // b


def _transition_kernel(x_ref, bnss_ref, w_ref, o_ref):
    # x_ref:    (TM, K_pad)   tile of unfolded input rows (bf16 or f32)
    # bnss_ref: (2, K_pad)    row 0 = folded BN scale, row 1 = folded BN shift (f32)
    # w_ref:    (K_pad, TCo)  conv weight as matmul operand (bf16 or f32), resident
    # o_ref:    (TM, TCo)     f32 output tile
    x = x_ref[...].astype(jnp.float32)
    y = x * bnss_ref[0:1, :] + bnss_ref[1:2, :]      # BatchNorm1d (affine, running stats)
    y = jnp.maximum(y, 0.0)                          # ReLU
    o_ref[...] = jnp.dot(
        y.astype(w_ref.dtype), w_ref[...], preferred_element_type=jnp.float32
    ).astype(o_ref.dtype)                            # Conv1d(k=2, s=2) as matmul on the MXU


def _tpu_tuning():
    try:
        kind = jax.devices()[0].device_kind.lower()
    except Exception:
        kind = ""
    is_v7 = ("v7" in kind) or ("7x" in kind)
    if is_v7 or not kind.startswith("tpu"):
        # v7x (or unknown): 64 MiB physical VMEM per TensorCore -> stay conservative.
        return dict(is_v7=is_v7, tile_budget=36 << 20, weight_budget=12 << 20,
                    vmem_limit=44 << 20)
    # v5e / v6e: 128 MiB physical VMEM -> spend the headroom on bigger M tiles.
    return dict(is_v7=False, tile_budget=80 << 20, weight_budget=24 << 20,
                vmem_limit=100 << 20)


def transition_forward(x, gamma, beta, running_mean, running_var, conv_w,
                       eps=1e-5, operand_dtype=jnp.bfloat16):
    """Fused BatchNorm1d (inference) -> ReLU -> Conv1d(k=2, s=2, no bias).

    x: (N, C_in, L) float32;  conv_w: (C_out, C_in, 2) float32.
    Returns (N, C_out, L // 2) float32.
    """
    N, C, L = x.shape
    C_out = conv_w.shape[0]
    assert L % 2 == 0
    Lh = L // 2
    M = N * Lh
    K = 2 * C

    tune = _tpu_tuning()
    itemsize = jnp.dtype(operand_dtype).itemsize

    # Lane-dense padding of the contraction and output-channel dims.
    K_pad = _round_up(K, 128)
    Co_pad = _round_up(C_out, 128)

    # --- C_out tiling: keep the resident (single-buffered) weight under its own budget ---
    if K_pad * Co_pad * itemsize <= tune["weight_budget"]:
        TCo, grid_co = Co_pad, 1
    else:
        tco_max = max(128, (tune["weight_budget"] // (itemsize * K_pad)) // 128 * 128)
        grid_co = _cdiv(Co_pad, tco_max)
        TCo = _round_up(_cdiv(Co_pad, grid_co), 128)
        Co_pad = TCo * grid_co
    # TODO(synk): if even K_pad*128 operands overflowed the weight budget (C_in > ~24k), a
    #             third "arbitrary" K grid axis with a VMEM accumulator would be required.

    # --- M tiling: biggest tile within the VMEM budget, floored at 256, multiple of 256 ---
    w_bytes = K_pad * TCo * itemsize                  # single-buffered (pl.Buffered(1))
    bnss_bytes = 8 * K_pad * 4                        # (2, K_pad) padded to 8 sublanes
    rem = tune["tile_budget"] - w_bytes - bnss_bytes
    # per-row cost: double-buffered x tile, double-buffered out tile, in-kernel temporaries.
    per_row = 2 * K_pad * itemsize + K_pad * (4 + itemsize) + 3 * TCo * 4
    TM = min(1024, max(256, (max(rem, 0) // per_row) // 256 * 256))
    M8 = _round_up(M, 8)
    if M8 <= TM:
        TM = M8                                       # small problem: single full tile ...
        if tune["is_v7"] and grid_co == 1 and M8 >= 16:
            TM = _round_up(_cdiv(M8, 2), 8)           # ... unless v7x: give both TCs work
    M_pad = _round_up(M, TM)                          # no ragged last block
    grid_m = M_pad // TM

    # --- fold BN params into per-K-position scale/shift (K index = k*C + c) ---
    scale_c = gamma / jnp.sqrt(running_var + eps)     # (C,)
    shift_c = beta - running_mean * scale_c           # (C,)
    bnss = jnp.zeros((2, K_pad), jnp.float32)
    bnss = bnss.at[0, :K].set(jnp.tile(scale_c, 2))
    bnss = bnss.at[1, :K].set(jnp.tile(shift_c, 2))

    # --- rearrange the input so the strided conv becomes one matmul ---
    # (N, C, L) -> (N, L, C) -> (M, K): row (n, t), column k*C + c holds x[n, c, 2t+k].
    # Cast before the transpose so the extra HBM pass moves half the bytes when bf16.
    x2 = jnp.transpose(x.astype(operand_dtype), (0, 2, 1)).reshape(M, K)
    x2 = jnp.pad(x2, ((0, M_pad - M), (0, K_pad - K)))

    # --- weight (C_out, C_in, 2) -> (K, C_out) with K index = k*C + c;  pad + cast ---
    w_mat = jnp.transpose(conv_w, (2, 1, 0)).reshape(K, C_out)
    w_mat = jnp.pad(w_mat, ((0, K_pad - K), (0, Co_pad - C_out))).astype(operand_dtype)

    cost = pl.CostEstimate(
        flops=2 * M_pad * K_pad * Co_pad,
        transcendentals=0,
        bytes_accessed=itemsize * (M_pad * K_pad + K_pad * Co_pad) + 4 * M_pad * Co_pad,
    )

    out_flat = pl.pallas_call(
        _transition_kernel,
        out_shape=jax.ShapeDtypeStruct((M_pad, Co_pad), jnp.float32),
        grid_spec=pltpu.PrefetchScalarGridSpec(
            num_scalar_prefetch=0,
            grid=(grid_co, grid_m),                   # M innermost: weight tile stays resident
            in_specs=[
                pl.BlockSpec((TM, K_pad), lambda j, i: (i, 0)),            # x, streamed over M
                pl.BlockSpec((2, K_pad), lambda j, i: (0, 0),
                             pipeline_mode=pl.Buffered(1)),                # BN scale/shift
                pl.BlockSpec((K_pad, TCo), lambda j, i: (0, j),
                             pipeline_mode=pl.Buffered(1)),                # weight, resident
            ],
            out_specs=pl.BlockSpec((TM, TCo), lambda j, i: (i, j)),
        ),
        compiler_params=pltpu.CompilerParams(
            dimension_semantics=("parallel", "parallel"),   # megacore sharding on v7x
            vmem_limit_bytes=tune["vmem_limit"],
        ),
        cost_estimate=cost,
    )(x2, bnss, w_mat)

    # strip padding, then (M, C_out) -> (N, Lh, C_out) -> (N, C_out, Lh)
    out = out_flat[:M, :C_out]
    return jnp.transpose(out.reshape(N, Lh, C_out), (0, 2, 1))


def _reference(x, gamma, beta, mean, var, w, eps=1e-5):
    # pure-JAX reference of the PyTorch forward (inference-mode BN)
    xn = (x - mean[None, :, None]) / jnp.sqrt(var[None, :, None] + eps)
    xn = xn * gamma[None, :, None] + beta[None, :, None]
    y = jnp.maximum(xn, 0.0)
    N, C, L = y.shape
    yr = y.reshape(N, C, L // 2, 2)                   # [n,c,t,k] = y[n,c,2t+k]
    return jnp.einsum("nctk,ock->not", yr, w)


if __name__ == "__main__":
    # Small shapes consistent with the module: Conv1d/BatchNorm1d operate on (N, C, L)
    N, C_in, C_out, L = 2, 4, 8, 16

    key = jax.random.PRNGKey(0)
    kx, kw, kg, kb, km, kv = jax.random.split(key, 6)

    x = jax.random.normal(kx, (N, C_in, L), dtype=jnp.float32)

    # Deterministic parameter init (shapes from __init__):
    #   bn:   gamma/beta/running_mean/running_var of shape (C_in,)
    #   conv: weight of shape (C_out, C_in, 2), no bias
    conv_w = jax.random.normal(kw, (C_out, C_in, 2), dtype=jnp.float32) * 0.1
    gamma = 1.0 + 0.1 * jax.random.normal(kg, (C_in,), dtype=jnp.float32)
    beta = 0.1 * jax.random.normal(kb, (C_in,), dtype=jnp.float32)
    running_mean = 0.1 * jax.random.normal(km, (C_in,), dtype=jnp.float32)
    running_var = 1.0 + 0.1 * jax.random.uniform(kv, (C_in,), dtype=jnp.float32)

    ref = _reference(x, gamma, beta, running_mean, running_var, conv_w)

    # f32-operand path: tight check against the reference.
    out_f32 = transition_forward(x, gamma, beta, running_mean, running_var, conv_w,
                                 operand_dtype=jnp.float32)
    out_f32 = jax.block_until_ready(out_f32)
    assert out_f32.shape == (N, C_out, L // 2), out_f32.shape
    assert jnp.allclose(out_f32, ref, atol=1e-5, rtol=1e-5), "f32 path mismatch vs reference"

    # Default fast path: bf16 MXU operands with f32 accumulation (~1e-3 relative error).
    out_bf16 = transition_forward(x, gamma, beta, running_mean, running_var, conv_w)
    out_bf16 = jax.block_until_ready(out_bf16)
    assert out_bf16.shape == (N, C_out, L // 2), out_bf16.shape
    assert jnp.allclose(out_bf16, ref, atol=2e-2, rtol=2e-2), "bf16 path mismatch vs reference"

    print("KERNEL_OK")
</pallas_src>

<mosaic_0001>
module attributes {stable_mosaic.version = 11 : i64} {
  func.func @_transition_kernel(%arg0: i32, %arg1: i32, %arg2: memref<16x128xf32, #tpu.memory_space<vmem>>, %arg3: memref<2x128xf32, #tpu.memory_space<vmem>>, %arg4: memref<128x128xf32, #tpu.memory_space<vmem>>, %arg5: memref<16x128xf32, #tpu.memory_space<vmem>>) attributes {dimension_semantics = [#tpu.dimension_semantics<parallel>, #tpu.dimension_semantics<parallel>], iteration_bounds = array<i64: 1, 1>, scalar_prefetch = 0 : i64, scratch_operands = 0 : i64, tpu.core_type = #tpu.core_type<tc>, window_params = [{transform_indices = @transform_0, window_bounds = array<i64: 16, 128>}, {pipeline_mode = #tpu.pipeline_mode<synchronous>, transform_indices = @transform_1, window_bounds = array<i64: 2, 128>}, {pipeline_mode = #tpu.pipeline_mode<synchronous>, transform_indices = @transform_2, window_bounds = array<i64: 128, 128>}, {transform_indices = @transform_3, window_bounds = array<i64: 16, 128>}]} {
    %c0 = arith.constant 0 : index
    %c0_0 = arith.constant 0 : index
    %0 = vector.load %arg2[%c0, %c0_0] : memref<16x128xf32, #tpu.memory_space<vmem>>, vector<16x128xf32>
    %c0_1 = arith.constant 0 : index
    %c0_2 = arith.constant 0 : index
    %1 = vector.load %arg3[%c0_1, %c0_2] : memref<2x128xf32, #tpu.memory_space<vmem>>, vector<1x128xf32>
    %2 = vector.broadcast %1 : vector<1x128xf32> to vector<16x128xf32>
    %3 = arith.mulf %0, %2 : vector<16x128xf32>
    %c1 = arith.constant 1 : index
    %c0_3 = arith.constant 0 : index
    %4 = vector.load %arg3[%c1, %c0_3] : memref<2x128xf32, #tpu.memory_space<vmem>>, vector<1x128xf32>
    %5 = vector.broadcast %4 : vector<1x128xf32> to vector<16x128xf32>
    %6 = arith.addf %3, %5 : vector<16x128xf32>
    %cst = arith.constant 0.000000e+00 : f32
    %7 = vector.broadcast %cst : f32 to vector<16x128xf32>
    %8 = arith.maximumf %6, %7 : vector<16x128xf32>
    %c0_4 = arith.constant 0 : index
    %c0_5 = arith.constant 0 : index
    %9 = vector.load %arg4[%c0_4, %c0_5] : memref<128x128xf32, #tpu.memory_space<vmem>>, vector<128x128xf32>
    %cst_6 = arith.constant dense<0.000000e+00> : vector<16x128xf32>
    %10 = tpu.matmul %8, %9, %cst_6 {dimension_numbers = #tpu.dot_dimension_numbers<[1], [0], [0], [1], [0, 0, 1, 1], [], []>} : vector<16x128xf32>, vector<128x128xf32>, vector<16x128xf32> -> vector<16x128xf32>
    %c0_7 = arith.constant 0 : index
    %c0_8 = arith.constant 0 : index
    %11 = vector.load %arg5[%c0_7, %c0_8] : memref<16x128xf32, #tpu.memory_space<vmem>>, vector<16x128xf32>
    tpu.vector_store %arg5[%c0_7, %c0_8], %10 {strides = array<i32>} : memref<16x128xf32, #tpu.memory_space<vmem>>, vector<16x128xf32>,
    return
  }
  func.func @transform_0(%arg0: i32, %arg1: i32) -> (i32, i32) {
    %c0_i32 = arith.constant 0 : i32
    %c0_i32_0 = arith.constant 0 : i32
    return %arg1, %c0_i32 : i32, i32
  }
  func.func @transform_1(%arg0: i32, %arg1: i32) -> (i32, i32) {
    %c0_i32 = arith.constant 0 : i32
    %c0_i32_0 = arith.constant 0 : i32
    %c0_i32_1 = arith.constant 0 : i32
    return %c0_i32, %c0_i32_0 : i32, i32
  }
  func.func @transform_2(%arg0: i32, %arg1: i32) -> (i32, i32) {
    %c0_i32 = arith.constant 0 : i32
    %c0_i32_0 = arith.constant 0 : i32
    return %c0_i32, %arg0 : i32, i32
  }
  func.func @transform_3(%arg0: i32, %arg1: i32) -> (i32, i32) {
    %c0_i32 = arith.constant 0 : i32
    return %arg1, %arg0 : i32, i32
  }
}

</mosaic_0001>

<bundles_post_ra>
// kernel: tpu_custom_call.1
= control target key start
LH: loop header
LB: loop body
LE: loop exit
PB: predicated region body
PF: predicated region fallthrough
CT: control target
= control target key end

     0   :  { %8 = vsyncpa [#allocation3], 0  ;;  %s412_s0 = inlined_call_operand.hbm [shape: f32[16,128], index: 0, kind: input, shape index: {}]   ;;  %s413_s1 = inlined_call_operand.vmem [shape: f32[2,128], index: 1, kind: input, shape index: {}]   ;;  %s414_s2 = inlined_call_operand.hbm [shape: f32[128,128], index: 2, kind: input, shape index: {}]   ;;  %s415_s3 = inlined_call_operand.hbm [shape: f32[16,128], index: 3, kind: output, shape index: {}]  }
   0x1   :  { %9 = vsyncpa [#allocation6], 0 }
   0x2   :  { %10 = vsyncpa [#allocation4], 0  ;;  %s336_s12 = smov [#allocation2]   ;;  %s264_s16 = scalar_lea.hbm %s412_s0, 256 }
   0x3   :  { %s16_s13 = sshll.u32 %s336_s12, 4  ;;  %p265_p0 = scmp.ne.s32.totalorder %s412_s0, %s264_s16  ;;  %s17_s13 = int_to_ptr.vmem [resolvable:$true] %s16_s13 }
   0x4   :  { %p268_p1 = scmp.lt.u32.totalorder %s264_s16, %s412_s0 }
   0x6   :  { %p270_p2 = pnand %p268_p1, %p265_p0 }
   0x8   :  { %273 = shalt.err (!%p270_p2)
}
   0x9   :  { %s274_s21 = scalar_lea.vmem %s17_s13, 256  ;;  %p279_p4 = scmp.lt.s32.totalorder %s17_s13, %s17_s13 }
   0xa   :  { %p275_p3 = scmp.ne.s32.totalorder %s17_s13, %s274_s21  ;;  %p280_p5 = scmp.lt.s32.totalorder %s274_s21, %s274_s21 }
   0xc   :  { %p281_p6 = por %p280_p5, %p279_p4 }
   0xe   :  { %p282_p7 = pnand %p281_p6, %p275_p3 }
  0x10   :  { %285 = shalt.err (!%p282_p7)
}
  0x11   :  { %s337_s22 = smov 128   ;;  %s338_s23 = smov 8  }
  0x12   :  { %22 = dma.hbm_to_vmem [thread:$0]  %s412_s0, 256, %s17_s13, [#allocation3], %s337_s22, %s337_s22, %s338_s23  }
  0x13   :  { %s339_s26 = smov [#allocation5]   ;;  %s286_s30 = scalar_lea.hbm %s414_s2, 2048 }
  0x14   :  { %s30_s27 = sshll.u32 %s339_s26, 4  ;;  %p287_p8 = scmp.ne.s32.totalorder %s414_s2, %s286_s30  ;;  %s31_s27 = int_to_ptr.vmem [resolvable:$true] %s30_s27 }
  0x15   :  { %p290_p9 = scmp.lt.u32.totalorder %s286_s30, %s414_s2 }
  0x17   :  { %p292_p10 = pnand %p290_p9, %p287_p8 }
  0x19   :  { %295 = shalt.err (!%p292_p10)
}
  0x1a   :  { %s296_s8 = scalar_lea.vmem %s31_s27, 2048  ;;  %p301_p12 = scmp.lt.s32.totalorder %s31_s27, %s31_s27 }
  0x1b   :  { %p297_p11 = scmp.ne.s32.totalorder %s31_s27, %s296_s8  ;;  %p302_p13 = scmp.lt.s32.totalorder %s296_s8, %s296_s8 }
  0x1d   :  { %p303_p0 = por %p302_p13, %p301_p12 }
  0x1f   :  { %p304_p1 = pnand %p303_p0, %p297_p11 }
  0x21   :  { %307 = shalt.err (!%p304_p1)
}
  0x22   :  { %36 = dma.hbm_to_vmem [thread:$0]  %s414_s2, 2048, %s31_s27, [#allocation6], %s337_s22, %s337_s22, %s338_s23  }
  0x23   :  { %330 = dma.done.wait [#allocation3], 256  }
  0x24   :  { %331 = vsyncadd [#allocation3], 4294967040 }
  0x25   :  { %332 = dma.done.wait [#allocation6], 2048  }
  0x26   :  { %333 = vsyncadd [#allocation6], 4294965248  ;;  %v61_v0 = vld [vmem:[#allocation5] sm:$0xff]  ;;  %v62_v1 = vld [vmem:[#allocation5 + $0x8] sm:$0xff] }
  0x27   :  { %v63_v2 = vld [vmem:[#allocation5 + $0x10] sm:$0xff]  ;;  %v227_v3 = vpack.c.bf16 %v62_v1, %v61_v0  ;;  %v64_v4 = vld [vmem:[#allocation5 + $0x18] sm:$0xff]  ;;  %v65_v6 = vld [vmem:[#allocation5 + $0x20] sm:$0xff] }
  0x28   :  { %v231_v5 = vpack.c.bf16 %v64_v4, %v63_v2  ;;  %v66_v7 = vld [vmem:[#allocation5 + $0x28] sm:$0xff]  ;;  %v67_v9 = vld [vmem:[#allocation5 + $0x30] sm:$0xff]  ;;  %v68_v11 = vld [vmem:[#allocation5 + $0x38] sm:$0xff] }
  0x29   :  { %228 = vmatprep.subr.bf16.mxu0 %v227_v3  ;;  %v235_v8 = vpack.c.bf16 %v66_v7, %v65_v6  ;;  %v43_v10 = vld [vmem:[#allocation2] sm:$0xff]  ;;  %v239_v15 = vpack.c.bf16 %v68_v11, %v67_v9  ;;  %v69_v17 = vld [vmem:[#allocation5 + $0x40] sm:$0xff]  ;;  %v70_v18 = vld [vmem:[#allocation5 + $0x48] sm:$0xff] }
  0x2a   :  { %230 = vmatpush3.bf16.msra.mxu0 %v227_v3  ;;  %v172_v12 = vld [vmem:[%s413_s1] ss:$0 sm:$0xff]  ;;  %v173_v13 = vld [vmem:[%s413_s1 + $0x1] ss:$0 sm:$0xff]  ;;  %v243_v20 = vpack.c.bf16 %v70_v18, %v69_v17  ;;  %v72_v22 = vld [vmem:[#allocation5 + $0x58] sm:$0xff]  ;;  %s340_s1 = smov [#allocation7]  }
  0x2b   :  { %232 = vmatprep.subr.bf16.mxu0 %v231_v5  ;;  %v50_v14 = vmul.f32 %v172_v12, %v43_v10  ;;  %v71_v21 = vld [vmem:[#allocation5 + $0x50] sm:$0xff]  ;;  %v73_v24 = vld [vmem:[#allocation5 + $0x60] sm:$0xff]  ;;  %v74_v25 = vld [vmem:[#allocation5 + $0x68] sm:$0xff]  ;;  %s159_s13 = sshll.u32 %s340_s1, 4  ;;  %s160_s13 = int_to_ptr.vmem [resolvable:$true] %s159_s13 }
  0x2c   :  { %v247_v23 = vpack.c.bf16 %v72_v22, %v71_v21  ;;  %v44_v26 = vld [vmem:[#allocation2 + $0x8] sm:$0xff]  ;;  %v251_v27 = vpack.c.bf16 %v74_v25, %v73_v24  ;;  %v75_v28 = vld [vmem:[#allocation5 + $0x70] sm:$0xff]  ;;  %s308_s14 = scalar_lea.vmem %s160_s13, 256  ;;  %p313_p3 = scmp.lt.s32.totalorder %s160_s13, %s160_s13 }
  0x2d   :  { %v57_v16 = vadd.f32 %v173_v13, %v50_v14  ;;  %v76_v29 = vld [vmem:[#allocation5 + $0x78] sm:$0xff]  ;;  %v51_v30 = vmul.f32 %v172_v12, %v44_v26  ;;  %p309_p2 = scmp.ne.s32.totalorder %s160_s13, %s308_s14  ;;  %p314_p4 = scmp.lt.s32.totalorder %s308_s14, %s308_s14 }
  0x2e   :  { %234 = vmatpush3.bf16.msra.mxu0 %v231_v5  ;;  %v255_v31 = vpack.c.bf16 %v76_v29, %v75_v28 }
  0x2f   :  { %236 = vmatprep.subr.bf16.mxu0 %v235_v8  ;;  %v59_v19 = vmax.f32 %v57_v16, 0.0  ;;  %v58_v32 = vadd.f32 %v173_v13, %v51_v30  ;;  %p315_p5 = por %p314_p4, %p313_p3 }
  0x31   :  { %224 = vmatprep.mubr.f32.mxu0 %v59_v19  ;;  %v60_v33 = vmax.f32 %v58_v32, 0.0  ;;  %p316_p6 = pnand %p315_p5, %p309_p2 }
  0x32   :  { %238 = vmatpush3.bf16.msra.mxu0 %v235_v8 }
  0x33   :  { %240 = vmatprep.subr.bf16.mxu0 %v239_v15 }
  0x36   :  { %242 = vmatpush3.bf16.msra.mxu0 %v239_v15 }
  0x37   :  { %244 = vmatprep.subr.bf16.mxu0 %v243_v20 }
  0x3a   :  { %246 = vmatpush3.bf16.msra.mxu0 %v243_v20 }
  0x3b   :  { %248 = vmatprep.subr.bf16.mxu0 %v247_v23 }
  0x3e   :  { %250 = vmatpush3.bf16.msra.mxu0 %v247_v23 }
  0x3f   :  { %252 = vmatprep.subr.bf16.mxu0 %v251_v27 }
  0x42   :  { %254 = vmatpush3.bf16.msra.mxu0 %v251_v27 }
  0x43   :  { %256 = vmatprep.subr.bf16.mxu0 %v255_v31 }
  0x46   :  { %258 = vmatpush3.bf16.msra.mxu0 %v255_v31 }
  0x49   :  { %225 = vmatmul.mubr.f32.vlgmr.msra.gmra.mrb[0].mxu0 %v60_v33 }
 0x11c   :  { %v226_v34 = vpop.f32.mrb[0].mxu0 }
 0x11d   :  { %153 = vst [vmem:[#allocation7 + $0x8] sm:$0xff] %v226_v34  ;;  %v143_v35 = vpop.f32.mrb[1].mxu0 }
 0x11e   :  { %152 = vst [vmem:[#allocation7] sm:$0xff] %v143_v35 }
 0x11f   :  { %319 = shalt.err (!%p316_p6)
}
 0x120   :  { %s320_s17 = scalar_lea.hbm %s415_s3, 256 }
 0x121   :  { %p321_p7 = scmp.ne.s32.totalorder %s415_s3, %s320_s17  ;;  %p324_p8 = scmp.lt.u32.totalorder %s320_s17, %s415_s3 }
 0x123   :  { %p326_p9 = pnand %p324_p8, %p321_p7 }
 0x125   :  { %329 = shalt.err (!%p326_p9)
}
 0x126   :  { %165 = dma.vmem_to_hbm [thread:$0]  %s160_s13, 256, %s415_s3, [#allocation4], %s337_s22, %s337_s22, %s338_s23  }
 0x127   :  { %334 = dma.done.wait [#allocation4], 256  }
 0x128   :  { %335 = vsyncadd [#allocation4], 4294967040 }
 0x129   :  { %169 = vsyncpa [#allocation3], 1 }
 0x12a   :  { %170 = vsyncpa [#allocation6], 1 }
 0x12b   :  { %171 = vsyncpa [#allocation4], 1 }

</bundles_post_ra>
